<compile_context>
chip_gen: v7x
topology: tpu7x:2x2x1
jax: 0.10.0
libtpu: 0.0.40
codegen_flags: <defaults>
</compile_context>

<pallas_src>
import functools

import jax
import jax.numpy as jnp
from jax.experimental import pallas as pl
from jax.experimental.pallas import tpu as pltpu

LANE = 128       # lane width: hidden/output feature dims padded to a multiple of this
SUBLANE = 16     # batch tiles rounded to a multiple of this (covers f32 and bf16 packing)


def _round_up(n, m):
    return ((n + m - 1) // m) * m


def _cdiv(a, b):
    return (a + b - 1) // b


def _dqn_kernel(x_ref, w1_ref, b1_ref, w2_ref, b2_ref, w3_ref, b3_ref, out_ref):
    # fc1 + ReLU: cast the f32 state tile to bf16 in-register (no wrapper HBM pass).
    x = x_ref[...].astype(jnp.bfloat16)                                   # (TB, d_in)
    h1 = jnp.dot(x, w1_ref[...], preferred_element_type=jnp.float32) + b1_ref[...]
    h1 = jnp.maximum(h1, 0.0)
    # fc2 + ReLU
    h2 = jnp.dot(h1.astype(jnp.bfloat16), w2_ref[...],
                 preferred_element_type=jnp.float32) + b2_ref[...]
    h2 = jnp.maximum(h2, 0.0)
    # fc3 (no activation)
    out = jnp.dot(h2.astype(jnp.bfloat16), w3_ref[...],
                  preferred_element_type=jnp.float32) + b3_ref[...]
    out_ref[...] = out.astype(out_ref.dtype)


def prepare_params(w1, b1, w2, b2, w3, b3):
    """Pad + cast parameters to the kernel layout ONCE (call outside the hot loop).

    w*: [in, out] f32, b*: [1, out] f32  ->  bf16 weights / f32 biases with out-dims
    (and downstream in-dims) zero-padded to a multiple of LANE.  Padding is exact:
    padded hidden columns are ReLU(0 + 0) = 0 and hit zero weight rows downstream.
    """
    f1, f2, na = w1.shape[1], w2.shape[1], w3.shape[1]
    f1_p, f2_p, na_p = (_round_up(d, LANE) for d in (f1, f2, na))
    w1_p = jnp.pad(w1, ((0, 0), (0, f1_p - f1))).astype(jnp.bfloat16)      # in-dim unpadded
    w2_p = jnp.pad(w2, ((0, f1_p - f1), (0, f2_p - f2))).astype(jnp.bfloat16)
    w3_p = jnp.pad(w3, ((0, f2_p - f2), (0, na_p - na))).astype(jnp.bfloat16)
    b1_p = jnp.pad(b1, ((0, 0), (0, f1_p - f1))).astype(jnp.float32)
    b2_p = jnp.pad(b2, ((0, 0), (0, f2_p - f2))).astype(jnp.float32)
    b3_p = jnp.pad(b3, ((0, 0), (0, na_p - na))).astype(jnp.float32)
    return w1_p, b1_p, w2_p, b2_p, w3_p, b3_p


@functools.partial(jax.jit, static_argnames=("n_actions", "batch_tile"))
def dqn_forward(state, w1_p, b1_p, w2_p, b2_p, w3_p, b3_p, *,
                n_actions, batch_tile=1024):
    """Forward pass.  state: [B, input_dims] f32; params from prepare_params().

    Returns [B, n_actions] f32 Q-values.
    """
    B, d_in = state.shape
    na_p = w3_p.shape[1]
    f1_p, f2_p = w1_p.shape[1], w2_p.shape[1]

    # Batch tile: bound padding waste (tb ~ ceil(B / n_target) rounded to SUBLANE)
    # and give v7x's two TensorCores >= 2 grid points when the batch can be split.
    max_tile = _round_up(batch_tile, SUBLANE)
    b_min = _round_up(B, SUBLANE)
    if b_min <= max_tile:
        n_target = 2 if b_min >= 2 * SUBLANE else 1
    else:
        n_target = _cdiv(b_min, max_tile)
    tb = _round_up(_cdiv(b_min, n_target), SUBLANE)
    b_p = _round_up(B, tb)
    n_tiles = b_p // tb

    # Only pad batch rows (no feature-dim pad, no dtype cast); no-op when aligned.
    x_p = state if b_p == B else jnp.pad(state, ((0, b_p - B), (0, 0)))

    # Weights/biases: full blocks with constant index_map -> resident in VMEM
    # across batch tiles.  At DQN sizes this is < 100 KiB total.
    # TODO(synk): for fc1/fc2 in the multi-thousand range (esp. on v7x, 64 MiB VMEM),
    # switch to a (batch, K) grid with an f32 VMEM accumulator instead of
    # full-resident weights.
    resident = lambda a: pl.BlockSpec(a.shape, lambda i: (0,) * a.ndim)

    flops = 2 * b_p * (d_in * f1_p + f1_p * f2_p + f2_p * na_p)
    bytes_accessed = (x_p.size * 4
                      + (w1_p.size + w2_p.size + w3_p.size) * 2
                      + (b1_p.size + b2_p.size + b3_p.size) * 4
                      + b_p * na_p * 4)

    out_p = pl.pallas_call(
        _dqn_kernel,
        out_shape=jax.ShapeDtypeStruct((b_p, na_p), jnp.float32),
        grid=(n_tiles,),
        in_specs=[
            # f32 state tile: last block dim == full array dim (exempt from 128 rule).
            pl.BlockSpec((tb, d_in), lambda i: (i, 0)),
            resident(w1_p), resident(b1_p),
            resident(w2_p), resident(b2_p),
            resident(w3_p), resident(b3_p),
        ],
        out_specs=pl.BlockSpec((tb, na_p), lambda i: (i, 0)),
        compiler_params=pltpu.CompilerParams(
            dimension_semantics=("parallel",),          # shard batch tiles across TCs on v7x
        ),
        cost_estimate=pl.CostEstimate(
            flops=flops, transcendentals=0, bytes_accessed=bytes_accessed),
    )(x_p, w1_p, b1_p, w2_p, b2_p, w3_p, b3_p)

    # Slice padded rows / columns off (cheap at DQN sizes).
    return out_p[:B, :n_actions]


def init_params(key, input_dims, fc1_dims, fc2_dims, n_actions):
    """Deterministic init mimicking nn.Linear's uniform(-1/sqrt(fan_in), 1/sqrt(fan_in))."""
    ks = jax.random.split(key, 6)

    def linear(kw, kb, fan_in, fan_out):
        bound = 1.0 / jnp.sqrt(fan_in)
        w = jax.random.uniform(kw, (fan_in, fan_out), jnp.float32, -bound, bound)
        b = jax.random.uniform(kb, (1, fan_out), jnp.float32, -bound, bound)
        return w, b

    w1, b1 = linear(ks[0], ks[1], input_dims, fc1_dims)
    w2, b2 = linear(ks[2], ks[3], fc1_dims, fc2_dims)
    w3, b3 = linear(ks[4], ks[5], fc2_dims, n_actions)
    return w1, b1, w2, b2, w3, b3


if __name__ == "__main__":
    # Small shapes consistent with the module's forward: state [B, input_dims].
    B, input_dims, fc1_dims, fc2_dims, n_actions = 8, 8, 32, 32, 4

    key = jax.random.PRNGKey(0)
    k_state, k_params = jax.random.split(key)
    state = jax.random.normal(k_state, (B, input_dims), jnp.float32)
    raw_params = init_params(k_params, input_dims, fc1_dims, fc2_dims, n_actions)

    # Pad/cast params ONCE, outside the per-step forward (as in an RL loop).
    params = jax.block_until_ready(prepare_params(*raw_params))

    actions = jax.block_until_ready(
        dqn_forward(state, *params, n_actions=n_actions))

    # Pure-JAX reference mirroring the kernel's numerics
    # (bf16 matmul inputs, f32 accumulation, f32 bias/ReLU).
    w1, b1, w2, b2, w3, b3 = raw_params
    bf = jnp.bfloat16
    ref = jnp.dot(state.astype(bf), w1.astype(bf), preferred_element_type=jnp.float32) + b1
    ref = jnp.maximum(ref, 0.0)
    ref = jnp.dot(ref.astype(bf), w2.astype(bf), preferred_element_type=jnp.float32) + b2
    ref = jnp.maximum(ref, 0.0)
    ref = jnp.dot(ref.astype(bf), w3.astype(bf), preferred_element_type=jnp.float32) + b3

    assert actions.shape == (B, n_actions)
    assert jnp.allclose(actions, ref, atol=2e-3, rtol=2e-3), (
        f"max abs err {jnp.max(jnp.abs(actions - ref))}")
    print("KERNEL_OK")
</pallas_src>

<mosaic_0001>
module attributes {stable_mosaic.version = 11 : i64} {
  func.func @_dqn_kernel(%arg0: i32, %arg1: memref<16x8xf32, #tpu.memory_space<vmem>>, %arg2: memref<8x128xbf16, #tpu.memory_space<vmem>>, %arg3: memref<1x128xf32, #tpu.memory_space<vmem>>, %arg4: memref<128x128xbf16, #tpu.memory_space<vmem>>, %arg5: memref<1x128xf32, #tpu.memory_space<vmem>>, %arg6: memref<128x128xbf16, #tpu.memory_space<vmem>>, %arg7: memref<1x128xf32, #tpu.memory_space<vmem>>, %arg8: memref<16x128xf32, #tpu.memory_space<vmem>>) attributes {dimension_semantics = [#tpu.dimension_semantics<parallel>], iteration_bounds = array<i64: 1>, scalar_prefetch = 0 : i64, scratch_operands = 0 : i64, tpu.core_type = #tpu.core_type<tc>, window_params = [{transform_indices = @transform_0, window_bounds = array<i64: 16, 8>}, {pipeline_mode = #tpu.pipeline_mode<synchronous>, transform_indices = @transform_1, window_bounds = array<i64: 8, 128>}, {pipeline_mode = #tpu.pipeline_mode<synchronous>, transform_indices = @transform_2, window_bounds = array<i64: 1, 128>}, {pipeline_mode = #tpu.pipeline_mode<synchronous>, transform_indices = @transform_3, window_bounds = array<i64: 128, 128>}, {pipeline_mode = #tpu.pipeline_mode<synchronous>, transform_indices = @transform_4, window_bounds = array<i64: 1, 128>}, {pipeline_mode = #tpu.pipeline_mode<synchronous>, transform_indices = @transform_5, window_bounds = array<i64: 128, 128>}, {pipeline_mode = #tpu.pipeline_mode<synchronous>, transform_indices = @transform_6, window_bounds = array<i64: 1, 128>}, {transform_indices = @transform_7, window_bounds = array<i64: 16, 128>}]} {
    %c0 = arith.constant 0 : index
    %c0_0 = arith.constant 0 : index
    %0 = vector.load %arg1[%c0, %c0_0] : memref<16x8xf32, #tpu.memory_space<vmem>>, vector<16x8xf32>
    %1 = arith.truncf %0 : vector<16x8xf32> to vector<16x8xbf16>
    %c0_1 = arith.constant 0 : index
    %c0_2 = arith.constant 0 : index
    %2 = vector.load %arg2[%c0_1, %c0_2] : memref<8x128xbf16, #tpu.memory_space<vmem>>, vector<8x128xbf16>
    %cst = arith.constant dense<0.000000e+00> : vector<16x128xf32>
    %3 = tpu.matmul %1, %2, %cst {dimension_numbers = #tpu.dot_dimension_numbers<[1], [0], [0], [1], [0, 0, 1, 1], [], []>} : vector<16x8xbf16>, vector<8x128xbf16>, vector<16x128xf32> -> vector<16x128xf32>
    %c0_3 = arith.constant 0 : index
    %c0_4 = arith.constant 0 : index
    %4 = vector.load %arg3[%c0_3, %c0_4] : memref<1x128xf32, #tpu.memory_space<vmem>>, vector<1x128xf32>
    %5 = vector.broadcast %4 : vector<1x128xf32> to vector<16x128xf32>
    %6 = arith.addf %3, %5 : vector<16x128xf32>
    %cst_5 = arith.constant 0.000000e+00 : f32
    %7 = vector.broadcast %cst_5 : f32 to vector<16x128xf32>
    %8 = arith.maximumf %6, %7 : vector<16x128xf32>
    %9 = arith.truncf %8 : vector<16x128xf32> to vector<16x128xbf16>
    %c0_6 = arith.constant 0 : index
    %c0_7 = arith.constant 0 : index
    %10 = vector.load %arg4[%c0_6, %c0_7] : memref<128x128xbf16, #tpu.memory_space<vmem>>, vector<128x128xbf16>
    %cst_8 = arith.constant dense<0.000000e+00> : vector<16x128xf32>
    %11 = tpu.matmul %9, %10, %cst_8 {dimension_numbers = #tpu.dot_dimension_numbers<[1], [0], [0], [1], [0, 0, 1, 1], [], []>} : vector<16x128xbf16>, vector<128x128xbf16>, vector<16x128xf32> -> vector<16x128xf32>
    %c0_9 = arith.constant 0 : index
    %c0_10 = arith.constant 0 : index
    %12 = vector.load %arg5[%c0_9, %c0_10] : memref<1x128xf32, #tpu.memory_space<vmem>>, vector<1x128xf32>
    %13 = vector.broadcast %12 : vector<1x128xf32> to vector<16x128xf32>
    %14 = arith.addf %11, %13 : vector<16x128xf32>
    %cst_11 = arith.constant 0.000000e+00 : f32
    %15 = vector.broadcast %cst_11 : f32 to vector<16x128xf32>
    %16 = arith.maximumf %14, %15 : vector<16x128xf32>
    %17 = arith.truncf %16 : vector<16x128xf32> to vector<16x128xbf16>
    %c0_12 = arith.constant 0 : index
    %c0_13 = arith.constant 0 : index
    %18 = vector.load %arg6[%c0_12, %c0_13] : memref<128x128xbf16, #tpu.memory_space<vmem>>, vector<128x128xbf16>
    %cst_14 = arith.constant dense<0.000000e+00> : vector<16x128xf32>
    %19 = tpu.matmul %17, %18, %cst_14 {dimension_numbers = #tpu.dot_dimension_numbers<[1], [0], [0], [1], [0, 0, 1, 1], [], []>} : vector<16x128xbf16>, vector<128x128xbf16>, vector<16x128xf32> -> vector<16x128xf32>
    %c0_15 = arith.constant 0 : index
    %c0_16 = arith.constant 0 : index
    %20 = vector.load %arg7[%c0_15, %c0_16] : memref<1x128xf32, #tpu.memory_space<vmem>>, vector<1x128xf32>
    %21 = vector.broadcast %20 : vector<1x128xf32> to vector<16x128xf32>
    %22 = arith.addf %19, %21 : vector<16x128xf32>
    %c0_17 = arith.constant 0 : index
    %c0_18 = arith.constant 0 : index
    %23 = vector.load %arg8[%c0_17, %c0_18] : memref<16x128xf32, #tpu.memory_space<vmem>>, vector<16x128xf32>
    tpu.vector_store %arg8[%c0_17, %c0_18], %22 {strides = array<i32>} : memref<16x128xf32, #tpu.memory_space<vmem>>, vector<16x128xf32>,
    return
  }
  func.func @transform_0(%arg0: i32) -> (i32, i32) {
    %c0_i32 = arith.constant 0 : i32
    %c0_i32_0 = arith.constant 0 : i32
    return %arg0, %c0_i32 : i32, i32
  }
  func.func @transform_1(%arg0: i32) -> (i32, i32) {
    %c0_i32 = arith.constant 0 : i32
    %c0_i32_0 = arith.constant 0 : i32
    %c0_i32_1 = arith.constant 0 : i32
    return %c0_i32, %c0_i32_0 : i32, i32
  }
  func.func @transform_2(%arg0: i32) -> (i32, i32) {
    %c0_i32 = arith.constant 0 : i32
    %c0_i32_0 = arith.constant 0 : i32
    %c0_i32_1 = arith.constant 0 : i32
    return %c0_i32, %c0_i32_0 : i32, i32
  }
  func.func @transform_3(%arg0: i32) -> (i32, i32) {
    %c0_i32 = arith.constant 0 : i32
    %c0_i32_0 = arith.constant 0 : i32
    %c0_i32_1 = arith.constant 0 : i32
    return %c0_i32, %c0_i32_0 : i32, i32
  }
  func.func @transform_4(%arg0: i32) -> (i32, i32) {
    %c0_i32 = arith.constant 0 : i32
    %c0_i32_0 = arith.constant 0 : i32
    %c0_i32_1 = arith.constant 0 : i32
    return %c0_i32, %c0_i32_0 : i32, i32
  }
  func.func @transform_5(%arg0: i32) -> (i32, i32) {
    %c0_i32 = arith.constant 0 : i32
    %c0_i32_0 = arith.constant 0 : i32
    %c0_i32_1 = arith.constant 0 : i32
    return %c0_i32, %c0_i32_0 : i32, i32
  }
  func.func @transform_6(%arg0: i32) -> (i32, i32) {
    %c0_i32 = arith.constant 0 : i32
    %c0_i32_0 = arith.constant 0 : i32
    %c0_i32_1 = arith.constant 0 : i32
    return %c0_i32, %c0_i32_0 : i32, i32
  }
  func.func @transform_7(%arg0: i32) -> (i32, i32) {
    %c0_i32 = arith.constant 0 : i32
    %c0_i32_0 = arith.constant 0 : i32
    return %arg0, %c0_i32 : i32, i32
  }
}

</mosaic_0001>

<bundles_post_ra>
// kernel: dqn_forward.1
= control target key start
LH: loop header
LB: loop body
LE: loop exit
PB: predicated region body
PF: predicated region fallthrough
CT: control target
= control target key end

     0   :  { %12 = vsyncpa [#allocation3], 0  ;;  %s626_s0 = inlined_call_operand.vmem [shape: f32[16,8], index: 0, kind: input, shape index: {}]   ;;  %s627_s1 = inlined_call_operand.vmem [shape: bf16[8,128], index: 1, kind: input, shape index: {}]   ;;  %s628_s2 = inlined_call_operand.vmem [shape: f32[1,128], index: 2, kind: input, shape index: {}]   ;;  %s629_s3 = inlined_call_operand.hbm [shape: bf16[128,128], index: 3, kind: input, shape index: {}]   ;;  %s630_s4 = inlined_call_operand.vmem [shape: f32[1,128], index: 4, kind: input, shape index: {}]   ;;  %s631_s5 = inlined_call_operand.hbm [shape: bf16[128,128], index: 5, kind: input, shape index: {}]   ;;  %s632_s6 = inlined_call_operand.vmem [shape: f32[1,128], index: 6, kind: input, shape index: {}]   ;;  %s633_s7 = inlined_call_operand.vmem [shape: f32[16,128], index: 7, kind: output, shape index: {}]  }
   0x1   :  { %13 = vsyncpa [#allocation5], 0  ;;  %s509_s24 = smov [#allocation2]   ;;  %s461_s28 = scalar_lea.hbm %s629_s3, 1024 }
   0x2   :  { %s25_s25 = sshll.u32 %s509_s24, 4  ;;  %p462_p0 = scmp.ne.s32.totalorder %s629_s3, %s461_s28  ;;  %s26_s25 = int_to_ptr.vmem [resolvable:$true] %s25_s25 }
   0x3   :  { %p465_p1 = scmp.lt.u32.totalorder %s461_s28, %s629_s3 }
   0x5   :  { %p467_p2 = pnand %p465_p1, %p462_p0 }
   0x7   :  { %470 = shalt.err (!%p467_p2)
}
   0x8   :  { %s471_s10 = scalar_lea.vmem %s26_s25, 1024  ;;  %p476_p4 = scmp.lt.s32.totalorder %s26_s25, %s26_s25 }
   0x9   :  { %p472_p3 = scmp.ne.s32.totalorder %s26_s25, %s471_s10  ;;  %p477_p5 = scmp.lt.s32.totalorder %s471_s10, %s471_s10 }
   0xb   :  { %p478_p6 = por %p477_p5, %p476_p4 }
   0xd   :  { %p479_p7 = pnand %p478_p6, %p472_p3 }
   0xf   :  { %482 = shalt.err (!%p479_p7)
}
  0x10   :  { %s510_s11 = smov 64   ;;  %s511_s12 = smov 4  }
  0x11   :  { %31 = dma.hbm_to_vmem [thread:$0]  %s629_s3, 1024, %s26_s25, [#allocation3], %s510_s11, %s510_s11, %s511_s12  }
  0x12   :  { %s512_s15 = smov [#allocation4]   ;;  %s483_s19 = scalar_lea.hbm %s631_s5, 1024 }
  0x13   :  { %s39_s16 = sshll.u32 %s512_s15, 4  ;;  %p484_p8 = scmp.ne.s32.totalorder %s631_s5, %s483_s19  ;;  %s40_s16 = int_to_ptr.vmem [resolvable:$true] %s39_s16 }
  0x14   :  { %p487_p9 = scmp.lt.u32.totalorder %s483_s19, %s631_s5 }
  0x16   :  { %p489_p10 = pnand %p487_p9, %p484_p8 }
  0x18   :  { %492 = shalt.err (!%p489_p10)
}
  0x19   :  { %s493_s24 = scalar_lea.vmem %s40_s16, 1024  ;;  %p498_p12 = scmp.lt.s32.totalorder %s40_s16, %s40_s16 }
  0x1a   :  { %p494_p11 = scmp.ne.s32.totalorder %s40_s16, %s493_s24  ;;  %p499_p13 = scmp.lt.s32.totalorder %s493_s24, %s493_s24 }
  0x1c   :  { %p500_p0 = por %p499_p13, %p498_p12 }
  0x1e   :  { %p501_p1 = pnand %p500_p0, %p494_p11 }
  0x20   :  { %504 = shalt.err (!%p501_p1)
}
  0x21   :  { %45 = dma.hbm_to_vmem [thread:$0]  %s631_s5, 1024, %s40_s16, [#allocation5], %s510_s11, %s510_s11, %s511_s12  }
  0x22   :  { %505 = dma.done.wait [#allocation3], 1024  }
  0x23   :  { %506 = vsyncadd [#allocation3], 4294966272 }
  0x24   :  { %507 = dma.done.wait [#allocation5], 1024  }
  0x25   :  { %508 = vsyncadd [#allocation5], 4294966272  ;;  %v513_v0 = vmov 0.0   ;;  %vm514_vm0 = vmmov 0   ;;  %vm70_vm1 = vcmask 1043456   ;;  %v55_v2 = vld [vmem:[%s626_s0] sm:$0xff] }
  0x26   :  { %393 = vmatprep.subr.bf16.mxu0 %v513_v0  ;;  %395 = vmatprep.mubr.msk.bf16.mxu0 %vm514_vm0, %v513_v0  ;;  %v58_v1 = vld [vmem:[%s627_s1] sm:$0xf]  ;;  %v56_v3 = vld [vmem:[%s626_s0 + $0x8] sm:$0xff]  ;;  %vm66_vm2 = vcmask 64512   ;;  %v447_v8 = vld [vmem:[#allocation2 + $0x10] sm:$0xff]  }
  0x27   :  { %399 = vmatprep.subr.bf16.mxu1 %v513_v0  ;;  %415 = vmatprep.mubr.msk.bf16.mxu1 %vm514_vm0, %v513_v0  ;;  %v72_v4 = vsel %vm70_vm1, %v58_v1, 0  ;;  %v57_v5 = vpack.c.bf16 %v56_v3, %v55_v2  ;;  %v445_v6 = vld [vmem:[#allocation2] sm:$0xff]   ;;  %v446_v7 = vld [vmem:[#allocation2 + $0x8] sm:$0xff]   ;;  %v448_v9 = vld [vmem:[#allocation2 + $0x18] sm:$0xff]  }
  0x28   :  { %394 = vmatpush3.bf16.msra.mxu0 %v72_v4  ;;  %400 = vmatpush3.bf16.msra.mxu1 %v445_v6  ;;  %v449_v10 = vld [vmem:[#allocation2 + $0x20] sm:$0xff]   ;;  %v450_v11 = vld [vmem:[#allocation2 + $0x28] sm:$0xff]   ;;  %v451_v12 = vld [vmem:[#allocation2 + $0x30] sm:$0xff]  }
  0x29   :  { %419 = vmatprep.subr.bf16.mxu0 %v513_v0  ;;  %401 = vmatprep.subr.bf16.mxu1 %v513_v0  ;;  %v452_v13 = vld [vmem:[#allocation2 + $0x38] sm:$0xff]   ;;  %v453_v14 = vld [vmem:[#allocation4] sm:$0xff]   ;;  %v454_v15 = vld [vmem:[#allocation4 + $0x8] sm:$0xff]  }
  0x2a   :  { %v455_v16 = vld [vmem:[#allocation4 + $0x10] sm:$0xff]   ;;  %v456_v17 = vld [vmem:[#allocation4 + $0x18] sm:$0xff]   ;;  %v457_v18 = vld [vmem:[#allocation4 + $0x20] sm:$0xff]  }
  0x2b   :  { %396 = vmatmul.mubr.msk.bf16.vlgmr.msra.gmra.mrb[0].mxu0 %vm66_vm2, %v57_v5  ;;  %v458_v19 = vld [vmem:[#allocation4 + $0x28] sm:$0xff]   ;;  %v353_v20 = vld [vmem:[%s628_s2] ss:$0 sm:$0xff]  ;;  %v459_v30 = vld [vmem:[#allocation4 + $0x30] sm:$0xff]  }
  0x2c   :  { %435 = vmatprep.mubr.msk.bf16.mxu0 %vm514_vm0, %v513_v0  ;;  %402 = vmatpush3.bf16.msra.mxu1 %v446_v7  ;;  %v460_v31 = vld [vmem:[#allocation4 + $0x38] sm:$0xff]   ;;  %v355_v32 = vld [vmem:[%s630_s4] ss:$0 sm:$0xff] }
  0x2d   :  { %403 = vmatprep.subr.bf16.mxu1 %v513_v0  ;;  %420 = vmatpush3.bf16.msra.mxu0 %v453_v14  ;;  %v364_v42 = vld [vmem:[%s632_s6] ss:$0 sm:$0xff] }
  0x2e   :  { %421 = vmatprep.subr.bf16.mxu0 %v513_v0 }
  0x30   :  { %404 = vmatpush3.bf16.msra.mxu1 %v447_v8 }
  0x31   :  { %405 = vmatprep.subr.bf16.mxu1 %v513_v0  ;;  %422 = vmatpush3.bf16.msra.mxu0 %v454_v15 }
  0x32   :  { %423 = vmatprep.subr.bf16.mxu0 %v513_v0 }
  0x34   :  { %406 = vmatpush3.bf16.msra.mxu1 %v448_v9 }
  0x35   :  { %407 = vmatprep.subr.bf16.mxu1 %v513_v0  ;;  %424 = vmatpush3.bf16.msra.mxu0 %v455_v16 }
  0x36   :  { %425 = vmatprep.subr.bf16.mxu0 %v513_v0 }
  0x38   :  { %408 = vmatpush3.bf16.msra.mxu1 %v449_v10 }
  0x39   :  { %409 = vmatprep.subr.bf16.mxu1 %v513_v0  ;;  %426 = vmatpush3.bf16.msra.mxu0 %v456_v17 }
  0x3a   :  { %427 = vmatprep.subr.bf16.mxu0 %v513_v0 }
  0x3c   :  { %410 = vmatpush3.bf16.msra.mxu1 %v450_v11 }
  0x3d   :  { %411 = vmatprep.subr.bf16.mxu1 %v513_v0  ;;  %428 = vmatpush3.bf16.msra.mxu0 %v457_v18 }
  0x3e   :  { %429 = vmatprep.subr.bf16.mxu0 %v513_v0 }
  0x40   :  { %412 = vmatpush3.bf16.msra.mxu1 %v451_v12 }
  0x41   :  { %413 = vmatprep.subr.bf16.mxu1 %v513_v0  ;;  %430 = vmatpush3.bf16.msra.mxu0 %v458_v19 }
  0x42   :  { %431 = vmatprep.subr.bf16.mxu0 %v513_v0 }
  0x44   :  { %414 = vmatpush3.bf16.msra.mxu1 %v452_v13 }
  0x45   :  { %432 = vmatpush3.bf16.msra.mxu0 %v459_v30 }
  0x46   :  { %433 = vmatprep.subr.bf16.mxu0 %v513_v0 }
  0x49   :  { %434 = vmatpush3.bf16.msra.mxu0 %v460_v31 }
  0xfe   :  { %v108_v21 = vpop.f32.mrb[0].mxu0 }
  0xff   :  { %v109_v22 = vadd.f32 %v353_v20, %v108_v21  ;;  %v397_v23 = vpop.f32.mrb[1].mxu0 }
 0x100   :  { %v111_v24 = vpop.f32.mrb[2].mxu0 }
 0x101   :  { %v112_v25 = vadd.f32 %v353_v20, %v111_v24  ;;  %v398_v26 = vpop.f32.mrb[3].mxu0  ;;  %v115_v27 = vmax.f32 %v109_v22, 0.0 }
 0x103   :  { %v116_v28 = vmax.f32 %v112_v25, 0.0 }
 0x105   :  { %v117_v29 = vpack.c.bf16 %v116_v28, %v115_v27 }
 0x107   :  { %416 = vmatmul.mubr.bf16.vlgmr.msra.gmra.mrb[0].mxu1 %v117_v29 }
 0x1da   :  { %v223_v33 = vpop.f32.mrb[0].mxu1 }
 0x1db   :  { %v224_v34 = vadd.f32 %v355_v32, %v223_v33  ;;  %v417_v35 = vpop.f32.mrb[1].mxu1 }
 0x1dc   :  { %v226_v36 = vpop.f32.mrb[2].mxu1 }
 0x1dd   :  { %v227_v37 = vadd.f32 %v355_v32, %v226_v36  ;;  %v418_v38 = vpop.f32.mrb[3].mxu1  ;;  %v230_v39 = vmax.f32 %v224_v34, 0.0 }
 0x1df   :  { %v231_v40 = vmax.f32 %v227_v37, 0.0 }
 0x1e1   :  { %v232_v41 = vpack.c.bf16 %v231_v40, %v230_v39 }
 0x1e3   :  { %436 = vmatmul.mubr.bf16.vlgmr.msra.gmra.mrb[4].mxu0 %v232_v41 }
 0x2b6   :  { %v338_v43 = vpop.f32.mrb[4].mxu0 }
 0x2b7   :  { %v339_v44 = vadd.f32 %v364_v42, %v338_v43  ;;  %v437_v45 = vpop.f32.mrb[5].mxu0 }
 0x2b8   :  { %v341_v46 = vpop.f32.mrb[6].mxu0 }
 0x2b9   :  { %345 = vst [vmem:[%s633_s7] sm:$0xff] %v339_v44  ;;  %v342_v47 = vadd.f32 %v364_v42, %v341_v46  ;;  %v438_v48 = vpop.f32.mrb[7].mxu0 }
 0x2bb   :  { %346 = vst [vmem:[%s633_s7 + $0x8] sm:$0xff] %v342_v47 }
 0x2bc   :  { %351 = vsyncpa [#allocation3], 1 }
 0x2bd   :  { %352 = vsyncpa [#allocation5], 1 }

</bundles_post_ra>
